<compile_context>
chip_gen: v7x
topology: tpu7x:2x2x1
jax: 0.10.0
libtpu: 0.0.40
codegen_flags: <defaults>
</compile_context>

<pallas_src>
import functools
import math
from typing import NamedTuple

import jax
import jax.numpy as jnp
import numpy as np
from jax.experimental import pallas as pl
from jax.experimental.pallas import tpu as pltpu

# fc1 = Linear(75, hidden) forces: C=input_size=5 channels, L=64:
#   layer1: 64 -(conv k=1)-> 64 -(pool2)-> 32
#   layer2: 32 -(conv k=3, valid)-> 30 -(pool2)-> 15 ;  5 * 15 = 75.
INPUT_SIZE = 5
HIDDEN_SIZE = 8
BATCH = 2
SEQ_LEN = 64
EPS = 1e-5  # PyTorch BatchNorm1d default eps


def _round_up(v, m):
    return ((v + m - 1) // m) * m


class _ParamLayout(NamedTuple):
    CP: int      # channels padded to a sublane tile (8)
    HP: int      # hidden units padded to a sublane tile (8)
    r_w2: int    # first row of the layer-2 conv weights
    r_w3: int    # first row of the lane-replicated fc1 weights (C blocks of HP rows)
    r_misc: int  # first row of selT / valid-mask / fc1 bias / fc2 weight+bias
    rows: int    # total rows of the packed parameter buffer


def _param_layout(C, H, N, J):
    CP = _round_up(C, 8)
    HP = _round_up(H, 8)
    r_w2 = CP
    r_w3 = 2 * CP
    r_misc = r_w3 + C * HP
    rows = r_misc + max(HP, _round_up(N + 1, 8))
    return _ParamLayout(CP, HP, r_w2, r_w3, r_misc, rows)


def _relation_kernel(x_ref, p_ref, out_ref, *, C, H, N, J, lay):
    # x_ref : (2C+1, 4W) lane = phase*W + batch*J + j (orig position = 4*j + phase);
    #         last row is all-ones (folds the conv1 bias into the matmul).
    # p_ref : (rows, 128) packed parameters (one DMA; see pack_params).
    # out_ref: (1, N) lane-dense sigmoid scores.
    CP, HP = lay.CP, lay.HP
    W = N * J                                       # lanes per phase block
    x = x_ref[...]                                  # (2C+1, 4W) f32
    p = p_ref[...]                                  # single load; value-sliced below

    # ---------------- layer1: Conv1d(k=1) + bias as one flat matmul -----------------
    w1e = p[0:CP, 0:2 * C + 1]                      # (CP, 2C+1), bias in last column
    h = jnp.dot(w1e, x, preferred_element_type=jnp.float32)            # (CP, 4W)

    # BatchNorm1d (train-mode batch stats, affine identity) fused to scale+shift, ReLU.
    inv1 = 1.0 / float(4 * W)                       # 1 / (N * L)
    s1 = jnp.sum(h, axis=1, keepdims=True)
    ss1 = jnp.sum(h * h, axis=1, keepdims=True)
    m1 = s1 * inv1
    v1 = jnp.maximum(ss1 * inv1 - m1 * m1, 0.0)     # clamp: one-pass var can go < 0
    a1 = jax.lax.rsqrt(v1 + EPS)
    h = jnp.maximum(h * a1 + (-m1 * a1), 0.0)       # (CP, 4W)

    # MaxPool1d(2): phases {0,1} -> even pooled slots, phases {2,3} -> odd slots.
    # hp[:, i] = h[:, i+1] (one full-width lane rotation == jnp.roll(h, -1, axis=1));
    # the wrapped lanes land on j == J-1 slots which are masked / zero-weighted below.
    hp = pltpu.roll(h, 4 * W - 1, 1)
    e = jnp.maximum(h[:, 0:W], h[:, W:2 * W])                          # pooled pos 2j
    o = jnp.maximum(h[:, 2 * W:3 * W], h[:, 3 * W:4 * W])              # pooled pos 2j+1
    ep = jnp.maximum(hp[:, 0:W], hp[:, W:2 * W])                       # pooled pos 2j+2
    op = jnp.maximum(hp[:, 2 * W:3 * W], hp[:, 3 * W:4 * W])           # pooled pos 2j+3

    # ---------------- layer2: Conv1d(k=3, valid) as per-tap matmuls -----------------
    dot = functools.partial(jnp.dot, preferred_element_type=jnp.float32)
    r2 = lay.r_w2
    w2_0 = p[r2:r2 + CP, 0:CP]
    w2_1 = p[r2:r2 + CP, CP:2 * CP]
    w2_2 = p[r2:r2 + CP, 2 * CP:3 * CP]
    b2 = p[r2:r2 + CP, 3 * CP:3 * CP + 1]
    c2e = dot(w2_0, e) + dot(w2_1, o) + dot(w2_2, ep) + b2             # conv out 2j
    c2o = dot(w2_0, o) + dot(w2_1, ep) + dot(w2_2, op) + b2            # conv out 2j+1

    # BatchNorm + ReLU over the N*2*(J-1) valid conv outputs (masked one-pass stats;
    # j == J-1 lanes carry batch-boundary garbage from the roll and are zeroed here).
    vmask = p[lay.r_misc + N:lay.r_misc + N + 1, 0:W]                  # (1, W) 1.0 iff j<J-1
    inv2 = 1.0 / float(2 * N * (J - 1))
    s2 = jnp.sum(vmask * (c2e + c2o), axis=1, keepdims=True)
    ss2 = jnp.sum(vmask * (c2e * c2e + c2o * c2o), axis=1, keepdims=True)
    m2 = s2 * inv2
    v2 = jnp.maximum(ss2 * inv2 - m2 * m2, 0.0)
    a2 = jax.lax.rsqrt(v2 + EPS)
    sh2 = -m2 * a2
    c2e = jnp.maximum(c2e * a2 + sh2, 0.0)
    c2o = jnp.maximum(c2o * a2 + sh2, 0.0)

    # MaxPool1d(2): max of even/odd conv slots.
    g = jnp.maximum(c2e, c2o)                                          # (CP, W)

    # ---------------- fc1 (75 -> H) via lane-replicated weights ---------------------
    # p rows [r_w3 + c*HP, +H) hold fw1[:, c, :] replicated across the N batch lane
    # blocks (zero column at j == J-1), so fc1 is C multiply-accumulates on (H, W)
    # plus one (H, W) x (N, W)^T batch-reduction matmul -- no in-kernel gather of g.
    r3 = lay.r_w3
    hsum = p[r3:r3 + H, 0:W] * g[0:1, :]
    for c in range(1, C):
        hsum = hsum + p[r3 + c * HP:r3 + c * HP + H, 0:W] * g[c:c + 1, :]
    selT = p[lay.r_misc:lay.r_misc + N, 0:W]                           # (N, W) batch selector
    zT = jax.lax.dot_general(hsum, selT, (((1,), (1,)), ((), ())),
                             preferred_element_type=jnp.float32)       # (H, N)

    # fc1 bias + ReLU, fc2 + sigmoid (batch kept on lanes; lane-dense (1, N) output).
    fb1 = p[lay.r_misc:lay.r_misc + H, W:W + 1]                        # (H, 1)
    fw2 = p[lay.r_misc:lay.r_misc + H, W + 1:W + 2]                    # (H, 1)
    fb2 = p[lay.r_misc:lay.r_misc + 1, W + 2:W + 3]                    # (1, 1)
    z = jnp.maximum(zT + fb1, 0.0)                                     # (H, N)
    y = jnp.sum(fw2 * z, axis=0, keepdims=True) + fb2                  # (1, N)
    out_ref[...] = 1.0 / (1.0 + jnp.exp(-y))


def pack_params(params, *, batch, seq_len,
                input_size=INPUT_SIZE, hidden_size=HIDDEN_SIZE):
    """Pack all weights/biases (+ masks / batch selectors) into one (rows, 128) f32
    buffer -> a single parameter DMA.  Call ONCE per (batch, seq_len); the result is
    call-invariant and is passed to the jitted forward."""
    w1, b1, w2, b2, fw1, fb1, fw2, fb2 = (np.asarray(a, np.float32) for a in params)
    C, H, N = input_size, hidden_size, batch
    assert seq_len % 4 == 0
    J = seq_len // 4
    W = N * J
    lay = _param_layout(C, H, N, J)
    assert fw1.shape == (H, C * (J - 1)), "fc1 in_features mismatch"
    assert 2 * C + 1 <= 128 and 3 * lay.CP + 1 <= 128 and W + 3 <= 128

    pk = np.zeros((lay.rows, 128), np.float32)
    # layer1: conv weight with bias folded as an extra input column.
    pk[0:C, 0:2 * C] = w1
    pk[0:C, 2 * C] = b1
    # layer2: the 3 conv taps side by side, bias in the column after them.
    for k in range(3):
        pk[lay.r_w2:lay.r_w2 + C, k * lay.CP:k * lay.CP + C] = w2[:, :, k]
    pk[lay.r_w2:lay.r_w2 + C, 3 * lay.CP] = b2
    # fc1 weights, lane-replicated per batch block (zero column at j == J-1).
    w3 = fw1.reshape(H, C, J - 1)
    for c in range(C):
        blk = np.zeros((H, W), np.float32)
        for n in range(N):
            blk[:, n * J:n * J + (J - 1)] = w3[:, c, :]
        pk[lay.r_w3 + c * lay.HP:lay.r_w3 + c * lay.HP + H, 0:W] = blk
    # batch-selection matrix, valid-lane mask, fc1 bias, fc2 weight/bias.
    for n in range(N):
        pk[lay.r_misc + n, n * J:(n + 1) * J] = 1.0
    vm = np.ones((W,), np.float32)
    vm[np.arange(N) * J + (J - 1)] = 0.0
    pk[lay.r_misc + N, 0:W] = vm
    pk[lay.r_misc:lay.r_misc + H, W] = fb1
    pk[lay.r_misc:lay.r_misc + H, W + 1] = fw2[0, :]
    pk[lay.r_misc, W + 2] = fb2[0]
    return jnp.asarray(pk)


@functools.partial(jax.jit, static_argnames=("input_size", "hidden_size"))
def relation_network_forward(x, packed_params, *,
                             input_size=INPUT_SIZE, hidden_size=HIDDEN_SIZE):
    """x: (N, 2*C, L) float32 in PyTorch NCL layout. Returns (N, 1) sigmoid scores.

    The whole forward (layout shuffle + kernel + output reshape) is one jitted XLA
    program; parameter packing lives in pack_params() and is hoisted out of the
    per-call path."""
    n, c2, L = x.shape
    C, H = input_size, hidden_size
    assert c2 == 2 * C and L % 4 == 0
    J = L // 4
    W = n * J
    lay = _param_layout(C, H, n, J)
    assert packed_params.shape == (lay.rows, 128)

    # NCL -> channels on sublanes, (phase, batch, position) on lanes; ones row folds
    # the conv1 bias into the matmul.
    xk = jnp.transpose(x.reshape(n, c2, J, 4), (1, 3, 0, 2)).reshape(c2, 4 * W)
    xk = jnp.concatenate([xk, jnp.ones((1, 4 * W), x.dtype)], axis=0)

    kern = functools.partial(_relation_kernel, C=C, H=H, N=n, J=J, lay=lay)
    out = pl.pallas_call(
        kern,
        out_shape=jax.ShapeDtypeStruct((1, n), jnp.float32),
        grid=(1,),
        in_specs=[pl.BlockSpec((c2 + 1, 4 * W), lambda i: (0, 0)),
                  pl.BlockSpec(packed_params.shape, lambda i: (0, 0))],
        out_specs=pl.BlockSpec((1, n), lambda i: (0, 0)),
        compiler_params=pltpu.CompilerParams(dimension_semantics=("arbitrary",)),
    )(xk, packed_params)
    return out.reshape(n, 1)


def reference_forward(x, params):
    """Pure-JAX replica of the PyTorch forward (train-mode BatchNorm)."""
    w1, b1, w2, b2, fw1, fb1, fw2, fb2 = params
    n, c2, L = x.shape
    c = c2 // 2
    hp = jax.lax.Precision.HIGHEST
    h = jnp.einsum('oc,ncl->nol', w1, x, precision=hp) + b1[None, :, None]
    h = (h - h.mean(axis=(0, 2), keepdims=True)) / jnp.sqrt(
        h.var(axis=(0, 2), keepdims=True) + EPS)
    h = jnp.maximum(h, 0.0)
    h = h.reshape(n, c, L // 2, 2).max(axis=-1)
    Lc = L // 2 - 2
    g = sum(jnp.einsum('oc,ncl->nol', w2[:, :, k], h[:, :, k:k + Lc], precision=hp)
            for k in range(3)) + b2[None, :, None]
    g = (g - g.mean(axis=(0, 2), keepdims=True)) / jnp.sqrt(
        g.var(axis=(0, 2), keepdims=True) + EPS)
    g = jnp.maximum(g, 0.0)
    g = g.reshape(n, c, Lc // 2, 2).max(axis=-1)
    f = g.reshape(n, -1)
    z = jnp.maximum(jnp.dot(f, fw1.T, precision=hp) + fb1[None, :], 0.0)
    y = jnp.dot(z, fw2.T, precision=hp) + fb2[None, :]
    return 1.0 / (1.0 + jnp.exp(-y))


if __name__ == "__main__":
    C, H, N, L = INPUT_SIZE, HIDDEN_SIZE, BATCH, SEQ_LEN
    feat = C * ((L // 2 - 2) // 2)
    assert feat == 75, "shapes must match fc1 = Linear(75, hidden)"

    key = jax.random.PRNGKey(0)
    ks = jax.random.split(key, 6)
    x = jax.random.normal(ks[0], (N, 2 * C, L), dtype=jnp.float32)

    # weights_init semantics (deterministic via jax PRNG):
    w1 = jax.random.normal(ks[1], (C, 2 * C), jnp.float32) * math.sqrt(2.0 / (1 * C))
    b1 = jnp.zeros((C,), jnp.float32)
    w2 = jax.random.normal(ks[2], (C, C, 3), jnp.float32) * math.sqrt(2.0 / (3 * C))
    b2 = jnp.zeros((C,), jnp.float32)
    fw1 = jax.random.normal(ks[3], (H, feat), jnp.float32) * 0.01
    fb1 = jnp.ones((H,), jnp.float32)          # Linear bias -> ones (weights_init)
    fw2 = jax.random.normal(ks[4], (1, H), jnp.float32) * 0.01
    fb2 = jnp.ones((1,), jnp.float32)
    # BatchNorm: gamma=1, beta=0 -> identity affine; train-mode batch stats used.
    # TODO(synk): running-mean/var buffer updates (training side effect) are not
    # modeled; they do not affect the forward output.
    params = (w1, b1, w2, b2, fw1, fb1, fw2, fb2)

    pk = pack_params(params, batch=N, seq_len=L)   # hoisted: packed once, reused per call

    out = jax.block_until_ready(relation_network_forward(x, pk))
    ref = jax.block_until_ready(reference_forward(x, params))

    assert out.shape == (N, 1)
    if not np.allclose(np.asarray(out), np.asarray(ref), atol=5e-3, rtol=0.0):
        raise AssertionError(f"kernel/reference mismatch:\n{out}\nvs\n{ref}")
    print("KERNEL_OK")
</pallas_src>

<mosaic_0001>
module attributes {stable_mosaic.version = 11 : i64} {
  func.func @_relation_kernel(%arg0: i32, %arg1: memref<11x128xf32, #tpu.memory_space<vmem>>, %arg2: memref<64x128xf32, #tpu.memory_space<vmem>>, %arg3: memref<1x2xf32, #tpu.memory_space<vmem>>) attributes {dimension_semantics = [#tpu.dimension_semantics<arbitrary>], iteration_bounds = array<i64: 1>, scalar_prefetch = 0 : i64, scratch_operands = 0 : i64, tpu.core_type = #tpu.core_type<tc>, window_params = [{pipeline_mode = #tpu.pipeline_mode<synchronous>, transform_indices = @transform_0, window_bounds = array<i64: 11, 128>}, {pipeline_mode = #tpu.pipeline_mode<synchronous>, transform_indices = @transform_1, window_bounds = array<i64: 64, 128>}, {pipeline_mode = #tpu.pipeline_mode<synchronous>, transform_indices = @transform_2, window_bounds = array<i64: 1, 2>}]} {
    %c0 = arith.constant 0 : index
    %c0_0 = arith.constant 0 : index
    %0 = vector.load %arg1[%c0, %c0_0] : memref<11x128xf32, #tpu.memory_space<vmem>>, vector<11x128xf32>
    %c0_1 = arith.constant 0 : index
    %c0_2 = arith.constant 0 : index
    %1 = vector.load %arg2[%c0_1, %c0_2] : memref<64x128xf32, #tpu.memory_space<vmem>>, vector<64x128xf32>
    %2 = vector.extract_strided_slice %1 {offsets = [0, 0], sizes = [8, 11], strides = [1, 1]} : vector<64x128xf32> to vector<8x11xf32>
    %cst = arith.constant dense<0.000000e+00> : vector<8x128xf32>
    %3 = tpu.matmul %2, %0, %cst {dimension_numbers = #tpu.dot_dimension_numbers<[1], [0], [0], [1], [0, 0, 1, 1], [], []>} : vector<8x11xf32>, vector<11x128xf32>, vector<8x128xf32> -> vector<8x128xf32>
    %cst_3 = arith.constant dense<0.000000e+00> : vector<8xf32>
    %4 = vector.multi_reduction <add>, %3, %cst_3 [1] : vector<8x128xf32> to vector<8xf32>
    %5 = vector.shape_cast %4 : vector<8xf32> to vector<8x1xf32>
    %6 = arith.mulf %3, %3 : vector<8x128xf32>
    %cst_4 = arith.constant dense<0.000000e+00> : vector<8xf32>
    %7 = vector.multi_reduction <add>, %6, %cst_4 [1] : vector<8x128xf32> to vector<8xf32>
    %8 = vector.shape_cast %7 : vector<8xf32> to vector<8x1xf32>
    %cst_5 = arith.constant 7.812500e-03 : f32
    %9 = vector.broadcast %cst_5 : f32 to vector<8x1xf32>
    %10 = arith.mulf %5, %9 : vector<8x1xf32>
    %cst_6 = arith.constant 7.812500e-03 : f32
    %11 = vector.broadcast %cst_6 : f32 to vector<8x1xf32>
    %12 = arith.mulf %8, %11 : vector<8x1xf32>
    %13 = arith.mulf %10, %10 : vector<8x1xf32>
    %14 = arith.subf %12, %13 : vector<8x1xf32>
    %cst_7 = arith.constant 0.000000e+00 : f32
    %15 = vector.broadcast %cst_7 : f32 to vector<8x1xf32>
    %16 = arith.maximumf %14, %15 : vector<8x1xf32>
    %cst_8 = arith.constant 9.99999974E-6 : f32
    %17 = vector.broadcast %cst_8 : f32 to vector<8x1xf32>
    %18 = arith.addf %16, %17 : vector<8x1xf32>
    %19 = math.rsqrt %18 : vector<8x1xf32>
    %20 = vector.broadcast %19 : vector<8x1xf32> to vector<8x128xf32>
    %21 = arith.mulf %3, %20 : vector<8x128xf32>
    %cst_9 = arith.constant 0.000000e+00 : f32
    %22 = vector.broadcast %cst_9 : f32 to vector<8x1xf32>
    %23 = arith.subf %22, %10 : vector<8x1xf32>
    %24 = arith.mulf %23, %19 : vector<8x1xf32>
    %25 = vector.broadcast %24 : vector<8x1xf32> to vector<8x128xf32>
    %26 = arith.addf %21, %25 : vector<8x128xf32>
    %cst_10 = arith.constant 0.000000e+00 : f32
    %27 = vector.broadcast %cst_10 : f32 to vector<8x128xf32>
    %28 = arith.maximumf %26, %27 : vector<8x128xf32>
    %c127_i32 = arith.constant 127 : i32
    %29 = tpu.dynamic_rotate %28 by %c127_i32 dim 1 : vector<8x128xf32>, i32 -> vector<8x128xf32>
    %30 = vector.extract_strided_slice %28 {offsets = [0, 0], sizes = [8, 32], strides = [1, 1]} : vector<8x128xf32> to vector<8x32xf32>
    %31 = vector.extract_strided_slice %28 {offsets = [0, 32], sizes = [8, 32], strides = [1, 1]} : vector<8x128xf32> to vector<8x32xf32>
    %32 = arith.maximumf %30, %31 : vector<8x32xf32>
    %33 = vector.extract_strided_slice %28 {offsets = [0, 64], sizes = [8, 32], strides = [1, 1]} : vector<8x128xf32> to vector<8x32xf32>
    %34 = vector.extract_strided_slice %28 {offsets = [0, 96], sizes = [8, 32], strides = [1, 1]} : vector<8x128xf32> to vector<8x32xf32>
    %35 = arith.maximumf %33, %34 : vector<8x32xf32>
    %36 = vector.extract_strided_slice %29 {offsets = [0, 0], sizes = [8, 32], strides = [1, 1]} : vector<8x128xf32> to vector<8x32xf32>
    %37 = vector.extract_strided_slice %29 {offsets = [0, 32], sizes = [8, 32], strides = [1, 1]} : vector<8x128xf32> to vector<8x32xf32>
    %38 = arith.maximumf %36, %37 : vector<8x32xf32>
    %39 = vector.extract_strided_slice %29 {offsets = [0, 64], sizes = [8, 32], strides = [1, 1]} : vector<8x128xf32> to vector<8x32xf32>
    %40 = vector.extract_strided_slice %29 {offsets = [0, 96], sizes = [8, 32], strides = [1, 1]} : vector<8x128xf32> to vector<8x32xf32>
    %41 = arith.maximumf %39, %40 : vector<8x32xf32>
    %42 = vector.extract_strided_slice %1 {offsets = [8, 0], sizes = [8, 8], strides = [1, 1]} : vector<64x128xf32> to vector<8x8xf32>
    %43 = vector.extract_strided_slice %1 {offsets = [8, 8], sizes = [8, 8], strides = [1, 1]} : vector<64x128xf32> to vector<8x8xf32>
    %44 = vector.extract_strided_slice %1 {offsets = [8, 16], sizes = [8, 8], strides = [1, 1]} : vector<64x128xf32> to vector<8x8xf32>
    %45 = vector.extract_strided_slice %1 {offsets = [8, 24], sizes = [8, 1], strides = [1, 1]} : vector<64x128xf32> to vector<8x1xf32>
    %cst_11 = arith.constant dense<0.000000e+00> : vector<8x32xf32>
    %46 = tpu.matmul %42, %32, %cst_11 {dimension_numbers = #tpu.dot_dimension_numbers<[1], [0], [0], [1], [0, 0, 1, 1], [], []>} : vector<8x8xf32>, vector<8x32xf32>, vector<8x32xf32> -> vector<8x32xf32>
    %cst_12 = arith.constant dense<0.000000e+00> : vector<8x32xf32>
    %47 = tpu.matmul %43, %35, %cst_12 {dimension_numbers = #tpu.dot_dimension_numbers<[1], [0], [0], [1], [0, 0, 1, 1], [], []>} : vector<8x8xf32>, vector<8x32xf32>, vector<8x32xf32> -> vector<8x32xf32>
    %48 = arith.addf %46, %47 : vector<8x32xf32>
    %cst_13 = arith.constant dense<0.000000e+00> : vector<8x32xf32>
    %49 = tpu.matmul %44, %38, %cst_13 {dimension_numbers = #tpu.dot_dimension_numbers<[1], [0], [0], [1], [0, 0, 1, 1], [], []>} : vector<8x8xf32>, vector<8x32xf32>, vector<8x32xf32> -> vector<8x32xf32>
    %50 = arith.addf %48, %49 : vector<8x32xf32>
    %51 = vector.broadcast %45 : vector<8x1xf32> to vector<8x32xf32>
    %52 = arith.addf %50, %51 : vector<8x32xf32>
    %cst_14 = arith.constant dense<0.000000e+00> : vector<8x32xf32>
    %53 = tpu.matmul %42, %35, %cst_14 {dimension_numbers = #tpu.dot_dimension_numbers<[1], [0], [0], [1], [0, 0, 1, 1], [], []>} : vector<8x8xf32>, vector<8x32xf32>, vector<8x32xf32> -> vector<8x32xf32>
    %cst_15 = arith.constant dense<0.000000e+00> : vector<8x32xf32>
    %54 = tpu.matmul %43, %38, %cst_15 {dimension_numbers = #tpu.dot_dimension_numbers<[1], [0], [0], [1], [0, 0, 1, 1], [], []>} : vector<8x8xf32>, vector<8x32xf32>, vector<8x32xf32> -> vector<8x32xf32>
    %55 = arith.addf %53, %54 : vector<8x32xf32>
    %cst_16 = arith.constant dense<0.000000e+00> : vector<8x32xf32>
    %56 = tpu.matmul %44, %41, %cst_16 {dimension_numbers = #tpu.dot_dimension_numbers<[1], [0], [0], [1], [0, 0, 1, 1], [], []>} : vector<8x8xf32>, vector<8x32xf32>, vector<8x32xf32> -> vector<8x32xf32>
    %57 = arith.addf %55, %56 : vector<8x32xf32>
    %58 = vector.broadcast %45 : vector<8x1xf32> to vector<8x32xf32>
    %59 = arith.addf %57, %58 : vector<8x32xf32>
    %60 = vector.extract_strided_slice %1 {offsets = [58, 0], sizes = [1, 32], strides = [1, 1]} : vector<64x128xf32> to vector<1x32xf32>
    %61 = arith.addf %52, %59 : vector<8x32xf32>
    %62 = vector.broadcast %60 : vector<1x32xf32> to vector<8x32xf32>
    %63 = arith.mulf %62, %61 : vector<8x32xf32>
    %cst_17 = arith.constant dense<0.000000e+00> : vector<8xf32>
    %64 = vector.multi_reduction <add>, %63, %cst_17 [1] : vector<8x32xf32> to vector<8xf32>
    %65 = vector.shape_cast %64 : vector<8xf32> to vector<8x1xf32>
    %66 = arith.mulf %52, %52 : vector<8x32xf32>
    %67 = arith.mulf %59, %59 : vector<8x32xf32>
    %68 = arith.addf %66, %67 : vector<8x32xf32>
    %69 = vector.broadcast %60 : vector<1x32xf32> to vector<8x32xf32>
    %70 = arith.mulf %69, %68 : vector<8x32xf32>
    %cst_18 = arith.constant dense<0.000000e+00> : vector<8xf32>
    %71 = vector.multi_reduction <add>, %70, %cst_18 [1] : vector<8x32xf32> to vector<8xf32>
    %72 = vector.shape_cast %71 : vector<8xf32> to vector<8x1xf32>
    %cst_19 = arith.constant 0.0166666675 : f32
    %73 = vector.broadcast %cst_19 : f32 to vector<8x1xf32>
    %74 = arith.mulf %65, %73 : vector<8x1xf32>
    %cst_20 = arith.constant 0.0166666675 : f32
    %75 = vector.broadcast %cst_20 : f32 to vector<8x1xf32>
    %76 = arith.mulf %72, %75 : vector<8x1xf32>
    %77 = arith.mulf %74, %74 : vector<8x1xf32>
    %78 = arith.subf %76, %77 : vector<8x1xf32>
    %cst_21 = arith.constant 0.000000e+00 : f32
    %79 = vector.broadcast %cst_21 : f32 to vector<8x1xf32>
    %80 = arith.maximumf %78, %79 : vector<8x1xf32>
    %cst_22 = arith.constant 9.99999974E-6 : f32
    %81 = vector.broadcast %cst_22 : f32 to vector<8x1xf32>
    %82 = arith.addf %80, %81 : vector<8x1xf32>
    %83 = math.rsqrt %82 : vector<8x1xf32>
    %cst_23 = arith.constant 0.000000e+00 : f32
    %84 = vector.broadcast %cst_23 : f32 to vector<8x1xf32>
    %85 = arith.subf %84, %74 : vector<8x1xf32>
    %86 = arith.mulf %85, %83 : vector<8x1xf32>
    %87 = vector.broadcast %83 : vector<8x1xf32> to vector<8x32xf32>
    %88 = arith.mulf %52, %87 : vector<8x32xf32>
    %89 = vector.broadcast %86 : vector<8x1xf32> to vector<8x32xf32>
    %90 = arith.addf %88, %89 : vector<8x32xf32>
    %cst_24 = arith.constant 0.000000e+00 : f32
    %91 = vector.broadcast %cst_24 : f32 to vector<8x32xf32>
    %92 = arith.maximumf %90, %91 : vector<8x32xf32>
    %93 = vector.broadcast %83 : vector<8x1xf32> to vector<8x32xf32>
    %94 = arith.mulf %59, %93 : vector<8x32xf32>
    %95 = vector.broadcast %86 : vector<8x1xf32> to vector<8x32xf32>
    %96 = arith.addf %94, %95 : vector<8x32xf32>
    %cst_25 = arith.constant 0.000000e+00 : f32
    %97 = vector.broadcast %cst_25 : f32 to vector<8x32xf32>
    %98 = arith.maximumf %96, %97 : vector<8x32xf32>
    %99 = arith.maximumf %92, %98 : vector<8x32xf32>
    %100 = vector.extract_strided_slice %1 {offsets = [16, 0], sizes = [8, 32], strides = [1, 1]} : vector<64x128xf32> to vector<8x32xf32>
    %101 = vector.extract_strided_slice %99 {offsets = [0, 0], sizes = [1, 32], strides = [1, 1]} : vector<8x32xf32> to vector<1x32xf32>
    %102 = vector.broadcast %101 : vector<1x32xf32> to vector<8x32xf32>
    %103 = arith.mulf %100, %102 : vector<8x32xf32>
    %104 = vector.extract_strided_slice %1 {offsets = [24, 0], sizes = [8, 32], strides = [1, 1]} : vector<64x128xf32> to vector<8x32xf32>
    %105 = vector.extract_strided_slice %99 {offsets = [1, 0], sizes = [1, 32], strides = [1, 1]} : vector<8x32xf32> to vector<1x32xf32>
    %106 = vector.broadcast %105 : vector<1x32xf32> to vector<8x32xf32>
    %107 = arith.mulf %104, %106 : vector<8x32xf32>
    %108 = arith.addf %103, %107 : vector<8x32xf32>
    %109 = vector.extract_strided_slice %1 {offsets = [32, 0], sizes = [8, 32], strides = [1, 1]} : vector<64x128xf32> to vector<8x32xf32>
    %110 = vector.extract_strided_slice %99 {offsets = [2, 0], sizes = [1, 32], strides = [1, 1]} : vector<8x32xf32> to vector<1x32xf32>
    %111 = vector.broadcast %110 : vector<1x32xf32> to vector<8x32xf32>
    %112 = arith.mulf %109, %111 : vector<8x32xf32>
    %113 = arith.addf %108, %112 : vector<8x32xf32>
    %114 = vector.extract_strided_slice %1 {offsets = [40, 0], sizes = [8, 32], strides = [1, 1]} : vector<64x128xf32> to vector<8x32xf32>
    %115 = vector.extract_strided_slice %99 {offsets = [3, 0], sizes = [1, 32], strides = [1, 1]} : vector<8x32xf32> to vector<1x32xf32>
    %116 = vector.broadcast %115 : vector<1x32xf32> to vector<8x32xf32>
    %117 = arith.mulf %114, %116 : vector<8x32xf32>
    %118 = arith.addf %113, %117 : vector<8x32xf32>
    %119 = vector.extract_strided_slice %1 {offsets = [48, 0], sizes = [8, 32], strides = [1, 1]} : vector<64x128xf32> to vector<8x32xf32>
    %120 = vector.extract_strided_slice %99 {offsets = [4, 0], sizes = [1, 32], strides = [1, 1]} : vector<8x32xf32> to vector<1x32xf32>
    %121 = vector.broadcast %120 : vector<1x32xf32> to vector<8x32xf32>
    %122 = arith.mulf %119, %121 : vector<8x32xf32>
    %123 = arith.addf %118, %122 : vector<8x32xf32>
    %124 = vector.extract_strided_slice %1 {offsets = [56, 0], sizes = [2, 32], strides = [1, 1]} : vector<64x128xf32> to vector<2x32xf32>
    %cst_26 = arith.constant dense<0.000000e+00> : vector<8x2xf32>
    %125 = tpu.matmul %123, %124, %cst_26 {dimension_numbers = #tpu.dot_dimension_numbers<[1], [1], [0], [0], [0, 0, 1, 0], [], []>} : vector<8x32xf32>, vector<2x32xf32>, vector<8x2xf32> -> vector<8x2xf32>
    %126 = vector.extract_strided_slice %1 {offsets = [56, 32], sizes = [8, 1], strides = [1, 1]} : vector<64x128xf32> to vector<8x1xf32>
    %127 = vector.extract_strided_slice %1 {offsets = [56, 33], sizes = [8, 1], strides = [1, 1]} : vector<64x128xf32> to vector<8x1xf32>
    %128 = vector.extract_strided_slice %1 {offsets = [56, 34], sizes = [1, 1], strides = [1, 1]} : vector<64x128xf32> to vector<1x1xf32>
    %129 = vector.broadcast %126 : vector<8x1xf32> to vector<8x2xf32>
    %130 = arith.addf %125, %129 : vector<8x2xf32>
    %cst_27 = arith.constant 0.000000e+00 : f32
    %131 = vector.broadcast %cst_27 : f32 to vector<8x2xf32>
    %132 = arith.maximumf %130, %131 : vector<8x2xf32>
    %133 = vector.broadcast %127 : vector<8x1xf32> to vector<8x2xf32>
    %134 = arith.mulf %133, %132 : vector<8x2xf32>
    %cst_28 = arith.constant dense<0.000000e+00> : vector<2xf32>
    %135 = vector.multi_reduction <add>, %134, %cst_28 [0] : vector<8x2xf32> to vector<2xf32>
    %136 = vector.shape_cast %135 : vector<2xf32> to vector<1x2xf32>
    %137 = vector.broadcast %128 : vector<1x1xf32> to vector<1x2xf32>
    %138 = arith.addf %136, %137 : vector<1x2xf32>
    %cst_29 = arith.constant 0.000000e+00 : f32
    %139 = vector.broadcast %cst_29 : f32 to vector<1x2xf32>
    %140 = arith.subf %139, %138 : vector<1x2xf32>
    %141 = math.exp %140 : vector<1x2xf32>
    %cst_30 = arith.constant 1.000000e+00 : f32
    %142 = vector.broadcast %cst_30 : f32 to vector<1x2xf32>
    %143 = arith.addf %142, %141 : vector<1x2xf32>
    %cst_31 = arith.constant 1.000000e+00 : f32
    %144 = vector.broadcast %cst_31 : f32 to vector<1x2xf32>
    %145 = arith.divf %144, %143 : vector<1x2xf32>
    %c0_32 = arith.constant 0 : index
    %c0_33 = arith.constant 0 : index
    %146 = vector.load %arg3[%c0_32, %c0_33] : memref<1x2xf32, #tpu.memory_space<vmem>>, vector<1x2xf32>
    tpu.vector_store %arg3[%c0_32, %c0_33], %145 {strides = array<i32>} : memref<1x2xf32, #tpu.memory_space<vmem>>, vector<1x2xf32>,
    return
  }
  func.func @transform_0(%arg0: i32) -> (i32, i32) {
    %c0_i32 = arith.constant 0 : i32
    %c0_i32_0 = arith.constant 0 : i32
    %c0_i32_1 = arith.constant 0 : i32
    return %c0_i32, %c0_i32_0 : i32, i32
  }
  func.func @transform_1(%arg0: i32) -> (i32, i32) {
    %c0_i32 = arith.constant 0 : i32
    %c0_i32_0 = arith.constant 0 : i32
    %c0_i32_1 = arith.constant 0 : i32
    return %c0_i32, %c0_i32_0 : i32, i32
  }
  func.func @transform_2(%arg0: i32) -> (i32, i32) {
    %c0_i32 = arith.constant 0 : i32
    %c0_i32_0 = arith.constant 0 : i32
    %c0_i32_1 = arith.constant 0 : i32
    return %c0_i32, %c0_i32_0 : i32, i32
  }
}

</mosaic_0001>

<bundles_post_ra>
// kernel: relation_network_forward.1
= control target key start
LH: loop header
LB: loop body
LE: loop exit
PB: predicated region body
PF: predicated region fallthrough
CT: control target
= control target key end

     0   :  { %vm26_vm0 = vcmask 1042432   ;;  %v884_v2 = vmov 0.0|0.0   ;;  %vm885_vm1 = vmmov 1   ;;  %vm886_vm3 = vmmov 0   ;;  %s995_s0 = inlined_call_operand.vmem [shape: f32[11,128], index: 0, kind: input, shape index: {}]   ;;  %s996_s1 = inlined_call_operand.vmem [shape: f32[64,128], index: 1, kind: input, shape index: {}]   ;;  %s997_s2 = inlined_call_operand.hbm [shape: f32[1,2], index: 2, kind: output, shape index: {}]  }
   0x1   :  { %v12_v0 = vld [vmem:[%s995_s0] sm:$0xff]  ;;  %v13_v1 = vld [vmem:[%s995_s0 + $0x8] sm:$0x7]  ;;  %829 = vmatprep.subr.bf16.mxu0 %v884_v2  ;;  %vm831_vm2 = vmpackc.low %vm26_vm0, %vm885_vm1  ;;  %v887_v4 = vmov 0.0  }
   0x2   :  { %v830_v3 = vpack.c.bf16 %v13_v1, %v12_v0  ;;  %791 = vmatprep.mubr.msk.f32.mxu0 %vm886_vm3, %v887_v4  ;;  %794 = vmatprep.subr.mxu1 %v887_v4 }
   0x3   :  { %7 = vsyncpa [#allocation3], 0  ;;  %v14_v5 = vld [vmem:[%s996_s1] sm:$0xff]  ;;  %vm22_vm4 = vcmask 89088   ;;  %796 = vmatprep.mubr.msk.f32.mxu1 %vm886_vm3, %v887_v4  ;;  %s888_s0 = smov 127   ;;  %s889_s15 = smov 96   ;;  %v578_v48 = vlaneseq }
   0x4   :  { %832 = vmatpush3.bf16.msk.msra.mxu0 %vm831_vm2, %v830_v3  ;;  %s890_s16 = smov 64   ;;  %v15_v26 = vld [vmem:[%s996_s1 + $0x8] sm:$0xff]  ;;  %s891_s19 = smov 120   ;;  %v893_v27 = vmov 24   ;;  %vm136_vm5 = vcmask 64512   ;;  %v21_v34 = vld [vmem:[%s996_s1 + $0x38] sm:$0xff] }
   0x5   :  { %804 = vmatprep.subr.mxu0 %v887_v4  ;;  %s892_s20 = smov 112   ;;  %847 = vset.pattern.permute.xlu1 %v893_v27  ;;  %vm583_vm6 = vcmask 261120   ;;  %v958_v49 = vshrl.u32 %v578_v48, 7  ;;  %v894_v2 = vmov 32   ;;  %v895_v3 = vmov 33   ;;  %v17_v27 = vld [vmem:[%s996_s1 + $0x18] sm:$0xff] }
   0x6   :  { %848 = vset.pattern.permute.xlu0 %v894_v2  ;;  %vm725_vm7 = vcmask 15360   ;;  %vm744_vm8 = vcmask 8192  }
   0x7   :  { %792 = vmatmul.mubr.msk.f32.vlgmr.msra.gmra.mrb[0].mxu0 %vm22_vm4, %v14_v5  ;;  %v580_v51 = vsub.s32 2, %v958_v49 }
   0x8   :  { %806 = vmatprep.mubr.msk.f32.mxu0 %vm886_vm3, %v887_v4 }
   0x9   :  { %v581_v57 = vrot.slane %v21_v34, %v580_v51 }
  0xda   :  { %v96_v6 = vpop.f32.mrb[0].mxu0 }
  0xdb   :  { %100 = vadd.xlane.f32.xlu0 %v96_v6  ;;  %v793_v7 = vpop.f32.mrb[1].mxu0  ;;  %v102_v8 = vmul.f32 %v96_v6, %v96_v6 }
  0xdf   :  { %103 = vadd.xlane.f32.xlu0 %v102_v8 }
 0x168   :  { %v101_v9 = vpop.xlane.xlu0 %100 }
 0x169   :  { %v105_v10 = vmul.f32 0.0078125, %v101_v9 }
 0x16b   :  { %v107_v12 = vmul.f32 %v105_v10, %v105_v10  ;;  %v113_v17 = vsub.f32 0.0, %v105_v10 }
 0x16c   :  { %v104_v11 = vpop.xlane.xlu0 %103 }
 0x16d   :  { %v106_v13 = vmul.f32 0.0078125, %v104_v11 }
 0x16f   :  { %v108_v14 = vsub.f32 %v106_v13, %v107_v12 }
 0x171   :  { %v109_v15 = vmax.f32 %v108_v14, 0.0 }
 0x173   :  { %v110_v16 = vadd.f32 1e-05, %v109_v15 }
 0x175   :  { %852 = vrsqrt.f32 %v110_v16 }
 0x17f   :  { %v853_v18 = vpop.eup %852 }
 0x180   :  { %v112_v19 = vmul.f32 %v853_v18, %v96_v6  ;;  %v114_v20 = vmul.f32 %v853_v18, %v113_v17 }
 0x182   :  { %v115_v21 = vadd.f32 %v114_v20, %v112_v19 }
 0x184   :  { %v116_v22 = vmax.f32 %v115_v21, 0.0 }
 0x186   :  { %117 = vrot.lane.b32.xlu1 %v116_v22, %s888_s0 }
 0x18a   :  { %120 = vrot.lane.b32.xlu1 %v116_v22, %s889_s15 }
 0x1f8   :  { %v118_v23 = vpop.permute.xlu1 %117 }
 0x1f9   :  { %125 = vrot.lane.b32.xlu0 %v118_v23, %s889_s15 }
 0x1fc   :  { %v121_v24 = vpop.permute.xlu1 %120 }
 0x1fd   :  { %v123_v25 = vmax.f32 %v116_v22, %v121_v24  ;;  %v612_v22 = vsub.s32 0, %v958_v49 }
 0x1ff   :  { %133 = vrot.lane.b32.xlu1 %v123_v25, %s890_s16 }
 0x203   :  { %130 = vrot.lane.b32.xlu1 %v15_v26, %s891_s19 }
 0x207   :  { %281 = vrot.lane.b32.xlu1 %v15_v26, %s892_s20 }
 0x26b   :  { %v126_v28 = vpop.permute.xlu0 %125 }
 0x26c   :  { %v128_v29 = vmax.f32 %v118_v23, %v126_v28  ;;  %v617_v23 = vsub.s32 1, %v958_v49 }
 0x26e   :  { %805 = vmatpush3.msra.mxu0 %v128_v29  ;;  %502 = vrot.lane.b32.xlu1 %v128_v29, %s890_s16 }
 0x26f   :  { %814 = vmatprep.subr.mxu0 %v887_v4 }
 0x271   :  { %v134_v30 = vpop.permute.xlu1 %133 }
 0x272   :  { %795 = vmatpush3.msra.mxu1 %v134_v30  ;;  %357 = vperm.xlu1 %847, %v15_v26  }
 0x273   :  { %799 = vmatprep.subr.mxu1 %v887_v4 }
 0x275   :  { %v131_v31 = vpop.permute.xlu1 %130 }
 0x276   :  { %797 = vmatmul.mubr.msk.f32.vlgmr.msra.gmra.mrb[0].mxu1 %vm136_vm5, %v131_v31  ;;  %849 = vset.pattern.permute.xlu1 %v895_v3 }
 0x277   :  { %800 = vmatpush3.msra.mxu1 %v123_v25  ;;  %801 = vmatprep.mubr.msk.f32.mxu1 %vm886_vm3, %v887_v4  ;;  %v629_v25 = vsub.s32 3, %v958_v49 }
 0x278   :  { %809 = vmatprep.subr.mxu1 %v887_v4 }
 0x279   :  { %v282_v32 = vpop.permute.xlu1 %281 }
 0x27a   :  { %802 = vmatmul.mubr.msk.f32.vlgmr.msra.gmra.mrb[2].mxu1 %vm136_vm5, %v15_v26  ;;  %807 = vmatmul.mubr.msk.f32.vlgmr.msra.gmra.mrb[2].mxu0 %vm136_vm5, %v282_v32 }
 0x27b   :  { %810 = vmatpush3.msra.mxu1 %v128_v29  ;;  %815 = vmatpush3.msra.mxu0 %v134_v30 }
 0x27c   :  { %811 = vmatprep.mubr.msk.f32.mxu1 %vm886_vm3, %v887_v4  ;;  %816 = vmatprep.mubr.msk.f32.mxu0 %vm886_vm3, %v887_v4 }
 0x27d   :  { %819 = vmatprep.subr.mxu1 %v887_v4  ;;  %824 = vmatprep.subr.mxu0 %v887_v4 }
 0x27e   :  { %812 = vmatmul.mubr.msk.f32.vlgmr.msra.gmra.mrb[4].mxu1 %vm136_vm5, %v131_v31  ;;  %817 = vmatmul.mubr.msk.f32.vlgmr.msra.gmra.mrb[4].mxu0 %vm136_vm5, %v15_v26  ;;  %v16_v26 = vld [vmem:[%s996_s1 + $0x10] sm:$0xff]  ;;  %v635_v31 = vsub.s32 4, %v958_v49 }
 0x27f   :  { %821 = vmatprep.mubr.msk.f32.mxu1 %vm886_vm3, %v887_v4  ;;  %826 = vmatprep.mubr.msk.f32.mxu0 %vm886_vm3, %v887_v4  ;;  %v896_v4 = vmov 34  }
 0x282   :  { %825 = vmatpush3.xpose.msk.msra.mxu0 %vm583_vm6, %v21_v34 }
 0x2e0   :  { %v503_v33 = vpop.permute.xlu1 %502 }
 0x2e1   :  { %820 = vmatpush3.msra.mxu1 %v503_v33 }
 0x2e2   :  { %822 = vmatmul.mubr.msk.f32.vlgmr.msra.gmra.mrb[6].mxu1 %vm136_vm5, %v282_v32  ;;  %v18_v32 = vld [vmem:[%s996_s1 + $0x20] sm:$0xff] }
 0x2f1   :  { %v358_v50 = vpop.permute.xlu1 %357 }
 0x349   :  { %v205_v35 = vpop.f32.mrb[0].mxu1 }
 0x34a   :  { %v798_v36 = vpop.f32.mrb[1].mxu1 }
 0x34b   :  { %v19_v36 = vld [vmem:[%s996_s1 + $0x28] sm:$0xff] }
 0x34d   :  { %v277_v37 = vpop.f32.mrb[2].mxu1  ;;  %v351_v38 = vpop.f32.mrb[2].mxu0 }
 0x34e   :  { %v278_v39 = vadd.f32 %v277_v37, %v205_v35  ;;  %v803_v40 = vpop.f32.mrb[3].mxu1  ;;  %v808_v41 = vpop.f32.mrb[3].mxu0 }
 0x34f   :  { %v20_v40 = vld [vmem:[%s996_s1 + $0x30] sm:$0xff]  ;;  %s897_s1 = smov [#allocation2]  }
 0x350   :  { %v355_v42 = vadd.f32 %v351_v38, %v278_v39  ;;  %s752_s5 = sshll.u32 %s897_s1, 4  ;;  %s753_s5 = int_to_ptr.vmem [resolvable:$true] %s752_s5 }
 0x351   :  { %v427_v43 = vpop.f32.mrb[4].mxu1  ;;  %v497_v44 = vpop.f32.mrb[4].mxu0  ;;  %s860_s6 = scalar_lea.vmem %s753_s5, 16  ;;  %s864_s7 = scalar_lea.vmem %s753_s5, 32 }
 0x352   :  { %v813_v45 = vpop.f32.mrb[5].mxu1  ;;  %v498_v46 = vadd.f32 %v497_v44, %v427_v43  ;;  %v818_v47 = vpop.f32.mrb[5].mxu0  ;;  %v360_v53 = vadd.f32 %v358_v50, %v355_v42  ;;  %p861_p0 = scmp.ne.s32.totalorder %s753_s5, %s860_s6  ;;  %p865_p1 = scmp.lt.s32.totalorder %s753_s5, %s753_s5 }
 0x353   :  { %p866_p2 = scmp.lt.s32.totalorder %s864_s7, %s860_s6 }
 0x354   :  { %v587_v58 = vmul.f32 %v360_v53, %v360_v53 }
 0x355   :  { %p867_p3 = por %p866_p2, %p865_p1 }
 0x357   :  { %p868_p4 = pnand %p867_p3, %p861_p0 }
 0x3b5   :  { %v571_v52 = vpop.f32.mrb[6].mxu1 }
 0x3b6   :  { %v575_v54 = vadd.f32 %v571_v52, %v498_v46  ;;  %v823_v55 = vpop.f32.mrb[7].mxu1 }
 0x3b8   :  { %v576_v56 = vadd.f32 %v575_v54, %v358_v50 }
 0x3ba   :  { %v577_v59 = vadd.f32 %v576_v56, %v360_v53  ;;  %v588_v60 = vmul.f32 %v576_v56, %v576_v56 }
 0x3bc   :  { %v582_v61 = vmul.f32 %v581_v57, %v577_v59  ;;  %v589_v62 = vadd.f32 %v588_v60, %v587_v58 }
 0x3be   :  { %v584_v63 = vsel %vm583_vm6, %v582_v61, 0.0  ;;  %v590_v0 = vmul.f32 %v589_v62, %v581_v57 }
 0x3bf   :  { %585 = vadd.xlane.f32.xlu1 %v584_v63 }
 0x3c0   :  { %v591_v1 = vsel %vm583_vm6, %v590_v0, 0.0 }
 0x3c1   :  { %592 = vadd.xlane.f32.xlu0 %v591_v1 }
 0x3d0   :  { %721 = vperm.xlu1 %849, %v21_v34  }
 0x3d4   :  { %850 = vset.pattern.permute.xlu1 %v896_v4 }
 0x3d5   :  { %734 = vperm.xlu1 %850, %v21_v34  }
 0x3d7   :  { %641 = vperm.xlu0 %848, %v21_v34  }
 0x3db   :  { %851 = vset.pattern.permute.xlu0 %v896_v4 }
 0x44c   :  { %v586_v5 = vpop.xlane.xlu1 %585 }
 0x44d   :  { %v594_v6 = vmul.f32 0.016666668, %v586_v5 }
 0x44e   :  { %v593_v7 = vpop.xlane.xlu0 %592 }
 0x44f   :  { %v596_v8 = vmul.f32 %v594_v6, %v594_v6  ;;  %v595_v9 = vmul.f32 0.016666668, %v593_v7  ;;  %v601_v13 = vsub.f32 0.0, %v594_v6 }
 0x450   :  { %v722_v50 = vpop.permute.xlu1 %721 }
 0x451   :  { %v597_v10 = vsub.f32 %v595_v9, %v596_v8 }
 0x453   :  { %v598_v11 = vmax.f32 %v597_v10, 0.0 }
 0x454   :  { %v735_v59 = vpop.permute.xlu1 %734 }
 0x455   :  { %v599_v12 = vadd.f32 1e-05, %v598_v11 }
 0x456   :  { %v642_v46 = vpop.permute.xlu0 %641 }
 0x457   :  { %854 = vrsqrt.f32 %v599_v12 }
 0x461   :  { %v855_v14 = vpop.eup %854 }
 0x462   :  { %v602_v15 = vmul.f32 %v855_v14, %v601_v13  ;;  %v603_v16 = vmul.f32 %v855_v14, %v360_v53  ;;  %v606_v17 = vmul.f32 %v855_v14, %v576_v56 }
 0x464   :  { %v604_v18 = vadd.f32 %v603_v16, %v602_v15  ;;  %v607_v19 = vadd.f32 %v606_v17, %v602_v15 }
 0x466   :  { %v605_v20 = vmax.f32 %v604_v18, 0.0  ;;  %v608_v21 = vmax.f32 %v607_v19, 0.0 }
 0x468   :  { %v609_v24 = vmax.f32 %v605_v20, %v608_v21 }
 0x46a   :  { %v613_v28 = vrot.slane %v609_v24, %v612_v22  ;;  %v618_v29 = vrot.slane %v609_v24, %v617_v23  ;;  %v624_v30 = vrot.slane %v609_v24, %v580_v51  ;;  %v630_v35 = vrot.slane %v609_v24, %v629_v25 }
 0x46b   :  { %v636_v39 = vrot.slane %v609_v24, %v635_v31 }
 0x46c   :  { %v614_v33 = vmul.f32 %v613_v28, %v16_v26  ;;  %v619_v34 = vmul.f32 %v618_v29, %v17_v27  ;;  %v625_v38 = vmul.f32 %v624_v30, %v18_v32  ;;  %v631_v42 = vmul.f32 %v630_v35, %v19_v36 }
 0x46d   :  { %v637_v44 = vmul.f32 %v636_v39, %v20_v40 }
 0x46e   :  { %v620_v37 = vadd.f32 %v619_v34, %v614_v33 }
 0x470   :  { %v626_v41 = vadd.f32 %v625_v38, %v620_v37 }
 0x472   :  { %v632_v43 = vadd.f32 %v631_v42, %v626_v41 }
 0x474   :  { %v638_v45 = vadd.f32 %v637_v44, %v632_v43 }
 0x476   :  { %827 = vmatmul.mubr.msk.f32.vlgmr.msra.gmra.mrb[6].mxu0 %vm583_vm6, %v638_v45 }
 0x549   :  { %v715_v47 = vpop.f32.mrb[6].mxu0 }
 0x54a   :  { %v716_v48 = vadd.f32 %v715_v47, %v642_v46  ;;  %v828_v49 = vpop.f32.mrb[7].mxu0 }
 0x54c   :  { %v719_v51 = vmax.f32 %v716_v48, 0.0 }
 0x54e   :  { %v724_v52 = vmul.f32 %v722_v50, %v719_v51 }
 0x550   :  { %v726_v53 = vsel %vm725_vm7, %v724_v52, 0.0 }
 0x551   :  { %v727_v54 = vrot.slane %v726_v53, 4 }
 0x553   :  { %v728_v55 = vadd.f32 %v727_v54, %v726_v53 }
 0x555   :  { %v729_v56 = vrot.slane %v728_v55, 2 }
 0x557   :  { %v730_v57 = vadd.f32 %v729_v56, %v728_v55 }
 0x559   :  { %v731_v58 = vrot.slane %v730_v57, 1 }
 0x55b   :  { %v732_v60 = vadd.f32 %v731_v58, %v730_v57 }
 0x55d   :  { %v737_v61 = vadd.f32 %v735_v59, %v732_v60 }
 0x55f   :  { %v738_v62 = vsub.f32 0.0, %v737_v61 }
 0x561   :  { %v739_v63 = vmul.f32 1.442695, %v738_v62 }
 0x563   :  { %856 = vpow2.f32 %v739_v63 }
 0x56d   :  { %v857_v0 = vpop.eup %856 }
 0x56e   :  { %v741_v1 = vadd.f32 1.0, %v857_v0 }
 0x570   :  { %858 = vrcp.f32 %v741_v1 }
 0x57a   :  { %v859_v2 = vpop.eup %858 }
 0x57b   :  { %745 = vst.msk [vmem:[#allocation2] sm:$0x1] %vm744_vm8, %v859_v2 }
 0x57c   :  { %871 = shalt.err (!%p868_p4)
}
 0x57d   :  { %s872_s10 = scalar_lea.hbm %s997_s2, 16 }
 0x57e   :  { %p873_p5 = scmp.ne.s32.totalorder %s997_s2, %s872_s10  ;;  %p876_p6 = scmp.lt.u32.totalorder %s872_s10, %s997_s2 }
 0x580   :  { %p878_p7 = pnand %p876_p6, %p873_p5 }
 0x582   :  { %881 = shalt.err (!%p878_p7)
}
 0x583   :  { %755 = dma.vmem_to_hbm [thread:$0]  %s753_s5, 16, %s997_s2, [#allocation3]  }
 0x584   :  { %882 = dma.done.wait [#allocation3], 16  }
 0x585   :  { %883 = vsyncadd [#allocation3], 4294967280 }
 0x586   :  { %759 = vsyncpa [#allocation3], 1 }

</bundles_post_ra>
